<compile_context>
chip_gen: v6e
topology: v6e:2x2x1
jax: 0.10.0
libtpu: 0.0.40
codegen_flags: <defaults>
</compile_context>

<pallas_src>
from functools import partial

import jax
import jax.numpy as jnp
import numpy as np
from jax.experimental import pallas as pl
from jax.experimental.pallas import tpu as pltpu

LANES = 128          # f32 lane width
TR_DEFAULT = 4096    # rows per grid block: 4096 * 128 * 4 B = 2 MiB per buffer


def _make_simpson_kernel(tr, n, s, scale, even_n, edge_blocks):
    """Build the per-block partial-sum kernel with all statics baked in.

    tr          : rows per block (multiple of 8)
    n           : total number of real samples
    s           : samples covered by the pure Simpson part (always odd)
    scale       : h / 3
    even_n      : whether the trapezoid tail on the last interval is needed
    edge_blocks : static tuple of block indices that need per-element fixups
                  (blocks holding samples 0, s-1, n-2, n-1 and the last block)
    """
    groups = tr // 8

    def kernel(x_ref, o_ref):
        i = pl.program_id(0)
        is_edge = (i == edge_blocks[0])
        for b in edge_blocks[1:]:
            is_edge = jnp.logical_or(is_edge, i == b)

        # ---- Hot path: interior blocks -------------------------------------
        # Every sample takes the interior composite-Simpson weight 2/4 chosen
        # by lane parity only (row width 128 is even, so global-index parity
        # == lane parity).  Sum the rows FIRST (~1 add per vreg), then apply
        # one (8,128) weight * h/3 constant to the row-sum.
        @pl.when(jnp.logical_not(is_edge))
        def _interior():
            xv = x_ref[...].astype(jnp.float32)
            rowsum = jnp.sum(xv.reshape(groups, 8, LANES), axis=0)
            lane = jax.lax.broadcasted_iota(jnp.int32, (8, LANES), 1)
            w = jnp.where((lane & 1) == 1, jnp.float32(4.0 * scale),
                          jnp.float32(2.0 * scale))
            o_ref[...] = w * rowsum

        # ---- Edge blocks (<= 3 of them) ------------------------------------
        # Full per-element weights: endpoint corrections (weight 1), even-N
        # trapezoid tail (+h/2 at n-2 and n-1), zero weight for idx >= s, and
        # zeroing of pad / out-of-range garbage (NaN-safe).  Processed in
        # (8,128) groups via fori_loop so VMEM temps stay a few vregs.
        @pl.when(is_edge)
        def _edge():
            base_elem = i * (tr * LANES)

            def body(g, acc):
                off = pl.multiple_of(g * 8, 8)
                row = jax.lax.broadcasted_iota(jnp.int32, (8, LANES), 0)
                lane = jax.lax.broadcasted_iota(jnp.int32, (8, LANES), 1)
                idx = base_elem + (off + row) * LANES + lane
                w = jnp.where((lane & 1) == 1, jnp.float32(4.0 * scale),
                              jnp.float32(2.0 * scale))
                w = jnp.where(idx >= s, jnp.float32(0.0), w)
                w = jnp.where(idx == 0, jnp.float32(scale), w)
                w = jnp.where(idx == s - 1, jnp.float32(scale), w)
                if even_n:
                    # Trapezoid rule on the last interval: +h/2 == 1.5*(h/3).
                    w = w + jnp.where((idx == n - 2) | (idx == n - 1),
                                      jnp.float32(1.5 * scale),
                                      jnp.float32(0.0))
                xg = x_ref[pl.ds(off, 8), :].astype(jnp.float32)
                xg = jnp.where(idx < n, xg, jnp.float32(0.0))  # kill pad/garbage
                return acc + w * xg

            o_ref[...] = jax.lax.fori_loop(
                0, groups, body, jnp.zeros((8, LANES), jnp.float32))

    return kernel


@partial(jax.jit, static_argnames=("h", "tile_rows"))
def simpson_integrate(x, h=1.0, tile_rows=TR_DEFAULT):
    """Pallas-backed equivalent of TestSimpson.forward(x) for a 1-D x.

    `h` must be a Python float (it is baked into the kernel as a constant).
    """
    if x.ndim != 1:
        raise ValueError("expected a 1-D tensor of function samples")
    n = int(x.shape[0])
    if n < 3:
        raise ValueError("composite Simpson needs at least 3 samples")

    # bf16 samples stay bf16 in HBM (half the traffic); everything else -> f32.
    if x.dtype != jnp.bfloat16:
        x = x.astype(jnp.float32)

    s = n if n % 2 == 1 else n - 1       # samples covered by pure Simpson
    scale = float(h) / 3.0

    # Lane+sublane dense slab.  When n is already a multiple of 128 (and has
    # >= 8 rows) the reshape is a free bitcast — no HBM copy; otherwise only
    # the tail is zero-padded to the next 128 multiple.  The grid's last block
    # masks its own out-of-range garbage, so no block-multiple padding.
    rows = max(8, -(-n // LANES))
    padded = rows * LANES
    xs = (x if padded == n else jnp.pad(x, (0, padded - n))).reshape(rows, LANES)

    tr = max(8, (int(tile_rows) // 8) * 8)
    tr = min(tr, (rows // 8) * 8)         # block rows never exceed array rows
    if rows >= 16:
        # Keep >= 2 blocks so both v7x TensorCores can stream ("parallel" axis).
        tr = min(tr, ((rows + 1) // 2 + 7) // 8 * 8)
    nb = -(-rows // tr)

    blk_elems = tr * LANES
    edge_blocks = tuple(sorted({0, (s - 1) // blk_elems,
                                max(n - 2, 0) // blk_elems, nb - 1}))

    kernel = _make_simpson_kernel(tr, n, s, scale, n % 2 == 0, edge_blocks)

    partials = pl.pallas_call(
        kernel,
        out_shape=jax.ShapeDtypeStruct((nb * 8, LANES), jnp.float32),
        grid=(nb,),
        in_specs=[pl.BlockSpec((tr, LANES), lambda i: (i, 0))],
        out_specs=pl.BlockSpec((8, LANES), lambda i: (i, 0)),
        compiler_params=pltpu.CompilerParams(
            dimension_semantics=("parallel",)),
    )(xs)

    # Each block emitted an (8,128) vector partial that already includes the
    # h/3 scale, endpoint corrections and the even-N trapezoid tail -> one
    # contiguous reduce finishes the integral.
    return jnp.sum(partials)


def simpson_reference(x, h=1.0):
    """Pure-numpy reference with identical semantics."""
    x = np.asarray(x, np.float64)
    n = x.shape[0]
    s = n if n % 2 == 1 else n - 1
    w = np.full(s, 2.0)
    w[1::2] = 4.0
    w[0] = 1.0
    w[-1] = 1.0
    total = (h / 3.0) * np.sum(w * x[:s])
    if n % 2 == 0:
        total += 0.5 * h * (x[-2] + x[-1])
    return total


if __name__ == "__main__":
    # Module's own test case: integral of identity samples over [0, 5] == 12.5.
    x_test = jnp.arange(6, dtype=jnp.float32)
    y_test = jax.block_until_ready(simpson_integrate(x_test))
    assert abs(float(y_test) - 12.5) < 1e-4, f"expected 12.5, got {float(y_test)}"

    key = jax.random.PRNGKey(0)

    def check(xv, tile_rows=TR_DEFAULT, tol=1e-3):
        y = jax.block_until_ready(simpson_integrate(xv, tile_rows=tile_rows))
        y_ref = simpson_reference(np.asarray(xv.astype(jnp.float32), np.float64))
        assert abs(float(y) - y_ref) <= tol * max(1.0, abs(y_ref)), (
            f"n={xv.shape[0]} tile_rows={tile_rows}: {float(y)} vs {y_ref}")

    # Small odd/even lengths (single padded block).
    for nn in (33, 48, 1023):
        key, sub = jax.random.split(key)
        check(jax.random.normal(sub, (nn,), dtype=jnp.float32))

    # 128-aligned length: copy-free bitcast reshape path, 2 blocks.
    key, sub = jax.random.split(key)
    check(jax.random.normal(sub, (2048,), dtype=jnp.float32), tile_rows=8)

    # Multi-block with true interior (hot-path) blocks, and sample n-2 landing
    # in the second-to-last block (n = k*block + 1 corner case).
    key, sub = jax.random.split(key)
    check(jax.random.normal(sub, (4097,), dtype=jnp.float32), tile_rows=8)

    # Even n with a partial final block (masked garbage rows).
    key, sub = jax.random.split(key)
    check(jax.random.normal(sub, (3000,), dtype=jnp.float32), tile_rows=8)

    # Default (large) tile size: block capped so the parallel grid keeps >= 2 blocks.
    key, sub = jax.random.split(key)
    check(jax.random.normal(sub, (20000,), dtype=jnp.float32))

    # bf16 sample path (bf16 in HBM, f32 weights/accumulation in-kernel).
    xb = (jnp.arange(2048, dtype=jnp.float32) * 1e-3).astype(jnp.bfloat16)
    yb = jax.block_until_ready(simpson_integrate(xb, tile_rows=8))
    yb_ref = simpson_reference(np.asarray(xb.astype(jnp.float32), np.float64))
    assert abs(float(yb) - yb_ref) <= 1e-3 * max(1.0, abs(yb_ref)), (
        f"bf16 mismatch: {float(yb)} vs {yb_ref}")

    print("KERNEL_OK")
</pallas_src>

<mosaic_0001>
module attributes {stable_mosaic.version = 11 : i64} {
  func.func @kernel(%arg0: i32, %arg1: memref<8x128xf32, #tpu.memory_space<vmem>>, %arg2: memref<8x128xf32, #tpu.memory_space<vmem>>) attributes {dimension_semantics = [#tpu.dimension_semantics<parallel>], iteration_bounds = array<i64: 1>, scalar_prefetch = 0 : i64, scratch_operands = 0 : i64, tpu.core_type = #tpu.core_type<tc>, window_params = [{transform_indices = @transform_0, window_bounds = array<i64: 8, 128>}, {transform_indices = @transform_1, window_bounds = array<i64: 8, 128>}]} {
    %c0_i32 = arith.constant 0 : i32
    %0 = arith.cmpi eq, %arg0, %c0_i32 : i32
    %true = arith.constant true
    %1 = arith.xori %0, %true : i1
    %2 = arith.extui %1 : i1 to i32
    %c0_i32_0 = arith.constant 0 : i32
    %3 = arith.cmpi ne, %2, %c0_i32_0 : i32
    scf.if %3 {
      %c0 = arith.constant 0 : index
      %c0_2 = arith.constant 0 : index
      %6 = vector.load %arg1[%c0, %c0_2] : memref<8x128xf32, #tpu.memory_space<vmem>>, vector<8x128xf32>
      %7 = vector.shape_cast %6 : vector<8x128xf32> to vector<1x8x128xf32>
      %cst = arith.constant dense<0.000000e+00> : vector<8x128xf32>
      %8 = vector.multi_reduction <add>, %7, %cst [0] : vector<1x8x128xf32> to vector<8x128xf32>
      %9 = tpu.iota {dimensions = array<i32: 1>} : vector<8x128xi32>
      %c1_i32 = arith.constant 1 : i32
      %10 = vector.broadcast %c1_i32 : i32 to vector<8x128xi32>
      %11 = arith.andi %9, %10 : vector<8x128xi32>
      %c1_i32_3 = arith.constant 1 : i32
      %12 = vector.broadcast %c1_i32_3 : i32 to vector<8x128xi32>
      %13 = arith.cmpi eq, %11, %12 : vector<8x128xi32>
      %cst_4 = arith.constant 1.33333337 : f32
      %cst_5 = arith.constant 0.666666686 : f32
      %14 = vector.broadcast %cst_4 : f32 to vector<8x128xf32>
      %15 = vector.broadcast %cst_5 : f32 to vector<8x128xf32>
      %16 = arith.select %13, %14, %15 : vector<8x128xi1>, vector<8x128xf32>
      %17 = arith.mulf %16, %8 : vector<8x128xf32>
      %c0_6 = arith.constant 0 : index
      %c0_7 = arith.constant 0 : index
      %18 = vector.load %arg2[%c0_6, %c0_7] : memref<8x128xf32, #tpu.memory_space<vmem>>, vector<8x128xf32>
      tpu.vector_store %arg2[%c0_6, %c0_7], %17 {strides = array<i32>} : memref<8x128xf32, #tpu.memory_space<vmem>>, vector<8x128xf32>,
    } else {
    }
    %4 = arith.extui %0 : i1 to i32
    %c0_i32_1 = arith.constant 0 : i32
    %5 = arith.cmpi ne, %4, %c0_i32_1 : i32
    scf.if %5 {
      %c1024_i32 = arith.constant 1024 : i32
      %6 = arith.muli %arg0, %c1024_i32 : i32
      %cst = arith.constant 0.000000e+00 : f32
      %7 = vector.broadcast %cst : f32 to vector<8x128xf32>
      %c0_i32_2 = arith.constant 0 : i32
      %c8_i32 = arith.constant 8 : i32
      %8 = arith.muli %c0_i32_2, %c8_i32 : i32
      %9 = tpu.assume_multiple %8, 8 : i32
      %10 = tpu.iota {dimensions = array<i32: 0>} : vector<8x128xi32>
      %11 = tpu.iota {dimensions = array<i32: 1>} : vector<8x128xi32>
      %12 = vector.broadcast %9 : i32 to vector<8x128xi32>
      %13 = arith.addi %12, %10 : vector<8x128xi32>
      %c128_i32 = arith.constant 128 : i32
      %14 = vector.broadcast %c128_i32 : i32 to vector<8x128xi32>
      %15 = arith.muli %13, %14 : vector<8x128xi32>
      %16 = vector.broadcast %6 : i32 to vector<8x128xi32>
      %17 = arith.addi %16, %15 : vector<8x128xi32>
      %18 = arith.addi %17, %11 : vector<8x128xi32>
      %c1_i32 = arith.constant 1 : i32
      %19 = vector.broadcast %c1_i32 : i32 to vector<8x128xi32>
      %20 = arith.andi %11, %19 : vector<8x128xi32>
      %c1_i32_3 = arith.constant 1 : i32
      %21 = vector.broadcast %c1_i32_3 : i32 to vector<8x128xi32>
      %22 = arith.cmpi eq, %20, %21 : vector<8x128xi32>
      %cst_4 = arith.constant 1.33333337 : f32
      %cst_5 = arith.constant 0.666666686 : f32
      %23 = vector.broadcast %cst_4 : f32 to vector<8x128xf32>
      %24 = vector.broadcast %cst_5 : f32 to vector<8x128xf32>
      %25 = arith.select %22, %23, %24 : vector<8x128xi1>, vector<8x128xf32>
      %c5_i32 = arith.constant 5 : i32
      %26 = vector.broadcast %c5_i32 : i32 to vector<8x128xi32>
      %27 = arith.cmpi sge, %18, %26 : vector<8x128xi32>
      %cst_6 = arith.constant 0.000000e+00 : f32
      %28 = vector.broadcast %cst_6 : f32 to vector<8x128xf32>
      %29 = arith.select %27, %28, %25 : vector<8x128xi1>, vector<8x128xf32>
      %c0_i32_7 = arith.constant 0 : i32
      %30 = vector.broadcast %c0_i32_7 : i32 to vector<8x128xi32>
      %31 = arith.cmpi eq, %18, %30 : vector<8x128xi32>
      %cst_8 = arith.constant 0.333333343 : f32
      %32 = vector.broadcast %cst_8 : f32 to vector<8x128xf32>
      %33 = arith.select %31, %32, %29 : vector<8x128xi1>, vector<8x128xf32>
      %c4_i32 = arith.constant 4 : i32
      %34 = vector.broadcast %c4_i32 : i32 to vector<8x128xi32>
      %35 = arith.cmpi eq, %18, %34 : vector<8x128xi32>
      %cst_9 = arith.constant 0.333333343 : f32
      %36 = vector.broadcast %cst_9 : f32 to vector<8x128xf32>
      %37 = arith.select %35, %36, %33 : vector<8x128xi1>, vector<8x128xf32>
      %c4_i32_10 = arith.constant 4 : i32
      %38 = vector.broadcast %c4_i32_10 : i32 to vector<8x128xi32>
      %39 = arith.cmpi eq, %18, %38 : vector<8x128xi32>
      %c5_i32_11 = arith.constant 5 : i32
      %40 = vector.broadcast %c5_i32_11 : i32 to vector<8x128xi32>
      %41 = arith.cmpi eq, %18, %40 : vector<8x128xi32>
      %42 = arith.ori %39, %41 : vector<8x128xi1>
      %cst_12 = arith.constant 5.000000e-01 : f32
      %cst_13 = arith.constant 0.000000e+00 : f32
      %43 = vector.broadcast %cst_12 : f32 to vector<8x128xf32>
      %44 = vector.broadcast %cst_13 : f32 to vector<8x128xf32>
      %45 = arith.select %42, %43, %44 : vector<8x128xi1>, vector<8x128xf32>
      %46 = arith.addf %37, %45 : vector<8x128xf32>
      %47 = arith.index_cast %9 : i32 to index
      %c0 = arith.constant 0 : index
      %48 = vector.load %arg1[%47, %c0] : memref<8x128xf32, #tpu.memory_space<vmem>>, vector<8x128xf32>
      %c6_i32 = arith.constant 6 : i32
      %49 = vector.broadcast %c6_i32 : i32 to vector<8x128xi32>
      %50 = arith.cmpi slt, %18, %49 : vector<8x128xi32>
      %cst_14 = arith.constant 0.000000e+00 : f32
      %51 = vector.broadcast %cst_14 : f32 to vector<8x128xf32>
      %52 = arith.select %50, %48, %51 : vector<8x128xi1>, vector<8x128xf32>
      %53 = arith.mulf %46, %52 : vector<8x128xf32>
      %54 = arith.addf %7, %53 : vector<8x128xf32>
      %c1_i32_15 = arith.constant 1 : i32
      %c0_16 = arith.constant 0 : index
      %c0_17 = arith.constant 0 : index
      %55 = vector.load %arg2[%c0_16, %c0_17] : memref<8x128xf32, #tpu.memory_space<vmem>>, vector<8x128xf32>
      tpu.vector_store %arg2[%c0_16, %c0_17], %54 {strides = array<i32>} : memref<8x128xf32, #tpu.memory_space<vmem>>, vector<8x128xf32>,
    } else {
    }
    return
  }
  func.func @transform_0(%arg0: i32) -> (i32, i32) {
    %c0_i32 = arith.constant 0 : i32
    %c0_i32_0 = arith.constant 0 : i32
    return %arg0, %c0_i32 : i32, i32
  }
  func.func @transform_1(%arg0: i32) -> (i32, i32) {
    %c0_i32 = arith.constant 0 : i32
    %c0_i32_0 = arith.constant 0 : i32
    return %arg0, %c0_i32 : i32, i32
  }
}

</mosaic_0001>

<bundles_post_ra>
// kernel: simpson_integrate.1
= control target key start
LH: loop header
LB: loop body
LE: loop exit
PB: predicated region body
PF: predicated region fallthrough
CT: control target
= control target key end

     0   :  { %v26_v0 = vlaneseq  ;;  %v61_v6 = vmov 0.6666667   ;;  %v62_v11 = vmov 0.0   ;;  %s79_s0 = inlined_call_operand.vmem [shape: f32[8,128], index: 0, kind: input, shape index: {}]   ;;  %s80_s1 = inlined_call_operand.vmem [shape: f32[8,128], index: 1, kind: output, shape index: {}]  }
   0x1   :  { %v49_v8 = vld [vmem:[%s79_s0] sm:$0xff] }
   0x2   :  { %v27_v1 = vshrl.u32 %v26_v0, 7  ;;  %v29_v2 = vand.u32 127, %v26_v0 }
   0x4   :  { %v32_v3 = vmul.u32 128, %v27_v1  ;;  %v36_v4 = vand.u32 1, %v29_v2 }
   0x6   :  { %v35_v5 = vadd.s32 %v32_v3, %v29_v2  ;;  %vm37_vm0 = vcmp.eq.s32.totalorder %v36_v4, 1 }
   0x7   :  { %v38_v7 = vsel %vm37_vm0, 1.3333334, %v61_v6 }
   0x8   :  { %vm39_vm1 = vcmp.ge.s32.totalorder %v35_v5, 5  ;;  %vm41_vm2 = vcmp.eq.s32.totalorder %v35_v5, 0  ;;  %vm43_vm3 = vcmp.eq.s32.totalorder %v35_v5, 4  ;;  %vm45_vm4 = vcmp.eq.s32.totalorder %v35_v5, 5 }
   0x9   :  { %v40_v9 = vsel %vm39_vm1, 0.0, %v38_v7  ;;  %vm46_vm5 = vmor %vm43_vm3, %vm45_vm4  ;;  %vm50_vm6 = vcmp.lt.s32.totalorder %v35_v5, 6 }
   0xa   :  { %v42_v10 = vsel %vm41_vm2, 0.33333334, %v40_v9  ;;  %v47_v12 = vsel %vm46_vm5, 0.5, %v62_v11  ;;  %v51_v14 = vsel %vm50_vm6, %v49_v8, 0.0 }
   0xb   :  { %v44_v13 = vsel %vm43_vm3, 0.33333334, %v42_v10 }
   0xc   :  { %v48_v15 = vadd.f32 %v47_v12, %v44_v13 }
   0xe   :  { %v52_v16 = vmul.f32 %v51_v14, %v48_v15 }
  0x10   :  { %54 = vst [vmem:[%s80_s1] sm:$0xff] %v52_v16 }

</bundles_post_ra>
